<compile_context>
chip_gen: v7x
topology: tpu7x:2x2x1
jax: 0.10.0
libtpu: 0.0.40
codegen_flags: <defaults>
</compile_context>

<pallas_src>
import functools

import jax
import jax.numpy as jnp
from jax.experimental import pallas as pl
from jax.experimental.pallas import tpu as pltpu


def coordatt_kernel(x_ref, pool_ref, exp_ref, w1_ref, b1_ref,
                    whw_ref, bhw_ref, out_ref, *, oup, h):
    nb, c, hw = x_ref.shape
    hp = pool_ref.shape[1]          # H + W
    mip = w1_ref.shape[0]

    # --- both adaptive average pools as one lane-dense MXU matmul -----------
    # pool_ref[k, p] = 1/W for p < H (mean over w), 1/H for p >= H (mean over h)
    x2 = x_ref[...].reshape(nb * c, hw).astype(jnp.float32)
    y = jnp.dot(x2, pool_ref[...], preferred_element_type=jnp.float32)
    y = y.reshape(nb, c, hp)                                   # (nb, C, H+W)

    # --- conv1 (1x1; BatchNorm folded wrapper-side) + h_swish ---------------
    w1b = jnp.broadcast_to(w1_ref[...], (nb, mip, c))
    y = jnp.einsum('nmc,ncp->nmp', w1b, y,
                   preferred_element_type=jnp.float32) + b1_ref[...][None]
    y = y * jnp.clip(y + 3.0, 0.0, 6.0) * (1.0 / 6.0)          # h_swish

    # --- conv_h & conv_w fused into one stacked matmul + sigmoid ------------
    whwb = jnp.broadcast_to(whw_ref[...], (nb, 2 * oup, mip))
    a = jnp.einsum('nom,nmp->nop', whwb, y,
                   preferred_element_type=jnp.float32) + bhw_ref[...][None]
    a = jax.nn.sigmoid(a)

    # --- combined gate directly in the (C, H*W) layout -----------------------
    # exp_ref[p, k] = 1{k//W == p} for p < H, 1{H + k%W == p} for p >= H.
    # Mask the halves of a_h / a_w that don't correspond to their rows of the
    # expansion matrix (tiny VPU op), then expand on the MXU:
    #   gh[., k] = a_h[., k//W]   gw[., k] = a_w[., H + k%W]
    col = jax.lax.broadcasted_iota(jnp.int32, (1, hp), 1)
    a_h = jnp.where(col < h, a[:, :oup, :].reshape(nb * oup, hp), 0.0)
    a_w = jnp.where(col >= h, a[:, oup:, :].reshape(nb * oup, hp), 0.0)
    gh = jnp.dot(a_h, exp_ref[...], preferred_element_type=jnp.float32)
    gw = jnp.dot(a_w, exp_ref[...], preferred_element_type=jnp.float32)
    gate = (gh * gw).reshape(nb, oup, hw)

    # --- single fused apply; re-read x here so the block isn't held live ----
    out_ref[...] = (x_ref[...].astype(jnp.float32) * gate).astype(out_ref.dtype)


def _pick_batch_block(n, per_sample_bytes, target_bytes=2 << 20):
    """Largest divisor of n whose block is <= target_bytes, keeping >=2 grid
    steps when possible (so both v7x TensorCores get work)."""
    cap = max(1, target_bytes // max(per_sample_bytes, 1))
    if n >= 2:
        cap = min(cap, max(1, n // 2))
    nb = 1
    for d in range(1, min(cap, n) + 1):
        if n % d == 0:
            nb = d
    return nb


def coord_att(x, params):
    N, C, H, W = x.shape
    HW, HP = H * W, H + W
    w1, b1, s1, t1, wh, bh, ww, bw = params
    mip = w1.shape[0]
    oup = wh.shape[0]
    assert oup == C, "CoordAtt output multiply requires oup == inp"

    f32 = jnp.float32
    # Fold eval-mode BatchNorm into conv1 (wrapper-side, free).
    w1f = (w1 * s1).astype(f32)                               # (mip, C)
    b1f = (b1 * s1 + t1).astype(f32)                          # (mip, 1)
    # Fuse conv_h / conv_w into one stacked weight.
    whw = jnp.concatenate([wh, ww], axis=0).astype(f32)       # (2*oup, mip)
    bhw = jnp.concatenate([bh, bw], axis=0).astype(f32)       # (2*oup, 1)

    # Constant pooling / expansion matrices for the lane-dense layout.
    k = jnp.arange(HW)
    ph = (k[:, None] // W == jnp.arange(H)[None, :]).astype(f32)    # (HW, H)
    pw = (k[:, None] % W == jnp.arange(W)[None, :]).astype(f32)     # (HW, W)
    pool = jnp.concatenate([ph / W, pw / H], axis=1)                # (HW, H+W)
    expand = jnp.concatenate([ph.T, pw.T], axis=0)                  # (H+W, HW)

    # Lane-dense view: flatten spatial dims into the last (lane) axis.
    x_flat = x.reshape(N, C, HW)

    itemsize = jnp.dtype(x.dtype).itemsize
    nb = _pick_batch_block(N, C * HW * itemsize)
    grid = (N // nb,)

    block_in = nb * C * HW * itemsize
    block_f32 = nb * C * HW * 4
    const_bytes = 4 * int(pool.size + expand.size +
                          w1f.size + b1f.size + whw.size + bhw.size)
    # Double-buffered in + out blocks + in-kernel f32 intermediates (gh, gw,
    # gate) + constants + headroom; capped well below v7x's 64 MiB physical
    # VMEM (never assume 128 MiB).
    vmem_limit = int(min(48 << 20,
                         max(16 << 20,
                             4 * block_in + 3 * block_f32
                             + 2 * const_bytes + (4 << 20))))

    kernel = functools.partial(coordatt_kernel, oup=oup, h=H)

    def const_spec(arr):
        nd = arr.ndim
        return pl.BlockSpec(arr.shape, lambda n, _nd=nd: (0,) * _nd)

    out_flat = pl.pallas_call(
        kernel,
        out_shape=jax.ShapeDtypeStruct((N, C, HW), x.dtype),
        grid=grid,
        in_specs=[
            pl.BlockSpec((nb, C, HW), lambda n: (n, 0, 0)),   # x (flat)
            const_spec(pool), const_spec(expand),
            const_spec(w1f), const_spec(b1f),
            const_spec(whw), const_spec(bhw),
        ],
        out_specs=pl.BlockSpec((nb, C, HW), lambda n: (n, 0, 0)),
        compiler_params=pltpu.CompilerParams(
            dimension_semantics=("parallel",),
            vmem_limit_bytes=vmem_limit),
    )(x_flat, pool, expand, w1f, b1f, whw, bhw)

    return out_flat.reshape(N, C, H, W)


def reference(x, params):
    """Pure-JAX reference matching the PyTorch forward (eval-mode BN),
    using the ORIGINAL (unfolded, unfused) parameters."""
    w1, b1, s1, t1, wh, bh, ww, bw = params
    N, C, H, W = x.shape
    x_h = jnp.mean(x, axis=3)                          # (N, C, H)
    x_w = jnp.mean(x, axis=2)                          # (N, C, W)
    y = jnp.concatenate([x_h, x_w], axis=2)            # (N, C, H+W)
    y = jnp.einsum('mc,nch->nmh', w1, y) + b1[None]
    y = y * s1[None] + t1[None]
    y = y * jnp.clip(y + 3.0, 0.0, 6.0) / 6.0
    y_h = y[:, :, :H]
    y_w = y[:, :, H:]
    a_h = jax.nn.sigmoid(jnp.einsum('om,nmh->noh', wh, y_h) + bh[None])
    a_w = jax.nn.sigmoid(jnp.einsum('om,nmw->now', ww, y_w) + bw[None])
    return x * a_h[:, :, :, None] * a_w[:, :, None, :]


if __name__ == "__main__":
    key = jax.random.PRNGKey(0)
    N, C, H, W = 2, 4, 16, 16
    inp = oup = C
    reduction = 32
    mip = max(8, inp // reduction)   # = 8

    ks = jax.random.split(key, 11)
    x = jax.random.normal(ks[0], (N, C, H, W), jnp.float32)

    # conv1: (mip, inp, 1, 1) -> (mip, inp), plus bias (mip, 1)
    w1 = 0.1 * jax.random.normal(ks[1], (mip, inp), jnp.float32)
    b1 = 0.1 * jax.random.normal(ks[2], (mip, 1), jnp.float32)

    # BatchNorm2d(mip) eval-mode, folded into per-channel scale/bias
    gamma = 1.0 + 0.1 * jax.random.normal(ks[3], (mip, 1), jnp.float32)
    beta = 0.1 * jax.random.normal(ks[4], (mip, 1), jnp.float32)
    running_mean = 0.1 * jax.random.normal(ks[5], (mip, 1), jnp.float32)
    running_var = jnp.abs(1.0 + 0.1 * jax.random.normal(ks[6], (mip, 1), jnp.float32))
    eps = 1e-5
    s1 = gamma / jnp.sqrt(running_var + eps)
    t1 = beta - running_mean * s1

    # conv_h / conv_w: (oup, mip, 1, 1) -> (oup, mip), plus bias (oup, 1)
    wh = 0.1 * jax.random.normal(ks[7], (oup, mip), jnp.float32)
    bh = 0.1 * jax.random.normal(ks[8], (oup, 1), jnp.float32)
    ww = 0.1 * jax.random.normal(ks[9], (oup, mip), jnp.float32)
    bw = 0.1 * jax.random.normal(ks[10], (oup, 1), jnp.float32)

    params = (w1, b1, s1, t1, wh, bh, ww, bw)

    out = coord_att(x, params)
    jax.block_until_ready(out)

    ref = reference(x, params)
    assert out.shape == (N, C, H, W)
    assert jnp.allclose(out, ref, atol=1e-4, rtol=1e-4), "mismatch vs reference"

    print("KERNEL_OK")
</pallas_src>

<mosaic_0001>
module attributes {stable_mosaic.version = 11 : i64} {
  func.func @coordatt_kernel(%arg0: i32, %arg1: memref<1x4x256xf32, #tpu.memory_space<vmem>>, %arg2: memref<256x32xf32, #tpu.memory_space<vmem>>, %arg3: memref<32x256xf32, #tpu.memory_space<vmem>>, %arg4: memref<8x4xf32, #tpu.memory_space<vmem>>, %arg5: memref<8x1xf32, #tpu.memory_space<vmem>>, %arg6: memref<8x8xf32, #tpu.memory_space<vmem>>, %arg7: memref<8x1xf32, #tpu.memory_space<vmem>>, %arg8: memref<1x4x256xf32, #tpu.memory_space<vmem>>) attributes {dimension_semantics = [#tpu.dimension_semantics<parallel>], iteration_bounds = array<i64: 2>, scalar_prefetch = 0 : i64, scratch_operands = 0 : i64, tpu.core_type = #tpu.core_type<tc>, window_params = [{transform_indices = @transform_0, window_bounds = array<i64: 1, 4, 256>}, {pipeline_mode = #tpu.pipeline_mode<synchronous>, transform_indices = @transform_1, window_bounds = array<i64: 256, 32>}, {pipeline_mode = #tpu.pipeline_mode<synchronous>, transform_indices = @transform_2, window_bounds = array<i64: 32, 256>}, {pipeline_mode = #tpu.pipeline_mode<synchronous>, transform_indices = @transform_3, window_bounds = array<i64: 8, 4>}, {pipeline_mode = #tpu.pipeline_mode<synchronous>, transform_indices = @transform_4, window_bounds = array<i64: 8, 1>}, {pipeline_mode = #tpu.pipeline_mode<synchronous>, transform_indices = @transform_5, window_bounds = array<i64: 8, 8>}, {pipeline_mode = #tpu.pipeline_mode<synchronous>, transform_indices = @transform_6, window_bounds = array<i64: 8, 1>}, {transform_indices = @transform_7, window_bounds = array<i64: 1, 4, 256>}]} {
    %c0 = arith.constant 0 : index
    %c0_0 = arith.constant 0 : index
    %c0_1 = arith.constant 0 : index
    %0 = vector.load %arg1[%c0, %c0_0, %c0_1] : memref<1x4x256xf32, #tpu.memory_space<vmem>>, vector<1x4x256xf32>
    %1 = vector.shape_cast %0 : vector<1x4x256xf32> to vector<4x256xf32>
    %c0_2 = arith.constant 0 : index
    %c0_3 = arith.constant 0 : index
    %2 = vector.load %arg2[%c0_2, %c0_3] : memref<256x32xf32, #tpu.memory_space<vmem>>, vector<256x32xf32>
    %cst = arith.constant dense<0.000000e+00> : vector<4x32xf32>
    %3 = tpu.matmul %1, %2, %cst {dimension_numbers = #tpu.dot_dimension_numbers<[1], [0], [0], [1], [0, 0, 1, 1], [], []>} : vector<4x256xf32>, vector<256x32xf32>, vector<4x32xf32> -> vector<4x32xf32>
    %4 = vector.shape_cast %3 : vector<4x32xf32> to vector<1x4x32xf32>
    %c0_4 = arith.constant 0 : index
    %c0_5 = arith.constant 0 : index
    %5 = vector.load %arg4[%c0_4, %c0_5] : memref<8x4xf32, #tpu.memory_space<vmem>>, vector<8x4xf32>
    %6 = vector.shape_cast %5 : vector<8x4xf32> to vector<1x8x4xf32>
    "tpu.trace_start"() <{level = 10 : i32, message = "nmc,ncp->nmp"}> : () -> ()
    %cst_6 = arith.constant dense<0.000000e+00> : vector<1x8x32xf32>
    %7 = tpu.matmul %6, %4, %cst_6 {dimension_numbers = #tpu.dot_dimension_numbers<[2], [1], [1], [2], [0, 0, 0, 1, 1, 2], [0], [0]>} : vector<1x8x4xf32>, vector<1x4x32xf32>, vector<1x8x32xf32> -> vector<1x8x32xf32>
    "tpu.trace_stop"() : () -> ()
    %c0_7 = arith.constant 0 : index
    %c0_8 = arith.constant 0 : index
    %8 = vector.load %arg5[%c0_7, %c0_8] : memref<8x1xf32, #tpu.memory_space<vmem>>, vector<8x1xf32>
    %9 = vector.shape_cast %8 : vector<8x1xf32> to vector<1x8x1xf32>
    %10 = vector.broadcast %9 : vector<1x8x1xf32> to vector<1x8x32xf32>
    %11 = arith.addf %7, %10 : vector<1x8x32xf32>
    %cst_9 = arith.constant 3.000000e+00 : f32
    %12 = vector.broadcast %cst_9 : f32 to vector<1x8x32xf32>
    %13 = arith.addf %11, %12 : vector<1x8x32xf32>
    %cst_10 = arith.constant 0.000000e+00 : f32
    %cst_11 = arith.constant 6.000000e+00 : f32
    %14 = vector.broadcast %cst_10 : f32 to vector<1x8x32xf32>
    %15 = arith.maximumf %14, %13 : vector<1x8x32xf32>
    %16 = vector.broadcast %cst_11 : f32 to vector<1x8x32xf32>
    %17 = arith.minimumf %16, %15 : vector<1x8x32xf32>
    %18 = arith.mulf %11, %17 : vector<1x8x32xf32>
    %cst_12 = arith.constant 0.166666672 : f32
    %19 = vector.broadcast %cst_12 : f32 to vector<1x8x32xf32>
    %20 = arith.mulf %18, %19 : vector<1x8x32xf32>
    %c0_13 = arith.constant 0 : index
    %c0_14 = arith.constant 0 : index
    %21 = vector.load %arg6[%c0_13, %c0_14] : memref<8x8xf32, #tpu.memory_space<vmem>>, vector<8x8xf32>
    %22 = vector.shape_cast %21 : vector<8x8xf32> to vector<1x8x8xf32>
    "tpu.trace_start"() <{level = 10 : i32, message = "nom,nmp->nop"}> : () -> ()
    %cst_15 = arith.constant dense<0.000000e+00> : vector<1x8x32xf32>
    %23 = tpu.matmul %22, %20, %cst_15 {dimension_numbers = #tpu.dot_dimension_numbers<[2], [1], [1], [2], [0, 0, 0, 1, 1, 2], [0], [0]>} : vector<1x8x8xf32>, vector<1x8x32xf32>, vector<1x8x32xf32> -> vector<1x8x32xf32>
    "tpu.trace_stop"() : () -> ()
    %c0_16 = arith.constant 0 : index
    %c0_17 = arith.constant 0 : index
    %24 = vector.load %arg7[%c0_16, %c0_17] : memref<8x1xf32, #tpu.memory_space<vmem>>, vector<8x1xf32>
    %25 = vector.shape_cast %24 : vector<8x1xf32> to vector<1x8x1xf32>
    %26 = vector.broadcast %25 : vector<1x8x1xf32> to vector<1x8x32xf32>
    %27 = arith.addf %23, %26 : vector<1x8x32xf32>
    %28 = arith.negf %27 : vector<1x8x32xf32>
    %29 = math.exp %28 : vector<1x8x32xf32>
    %cst_18 = arith.constant 1.000000e+00 : f32
    %30 = vector.broadcast %cst_18 : f32 to vector<1x8x32xf32>
    %31 = arith.addf %30, %29 : vector<1x8x32xf32>
    %32 = arith.divf %30, %31 : vector<1x8x32xf32>
    %33 = tpu.iota {dimensions = array<i32: 1>} : vector<1x32xi32>
    %c16_i32 = arith.constant 16 : i32
    %34 = vector.broadcast %c16_i32 : i32 to vector<1x32xi32>
    %35 = arith.cmpi slt, %33, %34 : vector<1x32xi32>
    %36 = vector.extract_strided_slice %32 {offsets = [0, 0, 0], sizes = [1, 4, 32], strides = [1, 1, 1]} : vector<1x8x32xf32> to vector<1x4x32xf32>
    %37 = vector.shape_cast %36 : vector<1x4x32xf32> to vector<4x32xf32>
    %cst_19 = arith.constant 0.000000e+00 : f32
    %38 = vector.shape_cast %35 : vector<1x32xi1> to vector<1x32xi1>
    %39 = vector.broadcast %38 : vector<1x32xi1> to vector<4x32xi1>
    %40 = vector.broadcast %cst_19 : f32 to vector<4x32xf32>
    %41 = arith.select %39, %37, %40 : vector<4x32xi1>, vector<4x32xf32>
    %c16_i32_20 = arith.constant 16 : i32
    %42 = vector.broadcast %c16_i32_20 : i32 to vector<1x32xi32>
    %43 = arith.cmpi sge, %33, %42 : vector<1x32xi32>
    %44 = vector.extract_strided_slice %32 {offsets = [0, 4, 0], sizes = [1, 4, 32], strides = [1, 1, 1]} : vector<1x8x32xf32> to vector<1x4x32xf32>
    %45 = vector.shape_cast %44 : vector<1x4x32xf32> to vector<4x32xf32>
    %cst_21 = arith.constant 0.000000e+00 : f32
    %46 = vector.shape_cast %43 : vector<1x32xi1> to vector<1x32xi1>
    %47 = vector.broadcast %46 : vector<1x32xi1> to vector<4x32xi1>
    %48 = vector.broadcast %cst_21 : f32 to vector<4x32xf32>
    %49 = arith.select %47, %45, %48 : vector<4x32xi1>, vector<4x32xf32>
    %c0_22 = arith.constant 0 : index
    %c0_23 = arith.constant 0 : index
    %50 = vector.load %arg3[%c0_22, %c0_23] : memref<32x256xf32, #tpu.memory_space<vmem>>, vector<32x256xf32>
    %cst_24 = arith.constant dense<0.000000e+00> : vector<4x256xf32>
    %51 = tpu.matmul %41, %50, %cst_24 {dimension_numbers = #tpu.dot_dimension_numbers<[1], [0], [0], [1], [0, 0, 1, 1], [], []>} : vector<4x32xf32>, vector<32x256xf32>, vector<4x256xf32> -> vector<4x256xf32>
    %c0_25 = arith.constant 0 : index
    %c0_26 = arith.constant 0 : index
    %52 = vector.load %arg3[%c0_25, %c0_26] : memref<32x256xf32, #tpu.memory_space<vmem>>, vector<32x256xf32>
    %cst_27 = arith.constant dense<0.000000e+00> : vector<4x256xf32>
    %53 = tpu.matmul %49, %52, %cst_27 {dimension_numbers = #tpu.dot_dimension_numbers<[1], [0], [0], [1], [0, 0, 1, 1], [], []>} : vector<4x32xf32>, vector<32x256xf32>, vector<4x256xf32> -> vector<4x256xf32>
    %54 = arith.mulf %51, %53 : vector<4x256xf32>
    %55 = vector.shape_cast %54 : vector<4x256xf32> to vector<1x4x256xf32>
    %c0_28 = arith.constant 0 : index
    %c0_29 = arith.constant 0 : index
    %c0_30 = arith.constant 0 : index
    %56 = vector.load %arg1[%c0_28, %c0_29, %c0_30] : memref<1x4x256xf32, #tpu.memory_space<vmem>>, vector<1x4x256xf32>
    %57 = arith.mulf %56, %55 : vector<1x4x256xf32>
    %c0_31 = arith.constant 0 : index
    %c0_32 = arith.constant 0 : index
    %c0_33 = arith.constant 0 : index
    %58 = vector.load %arg8[%c0_31, %c0_32, %c0_33] : memref<1x4x256xf32, #tpu.memory_space<vmem>>, vector<1x4x256xf32>
    tpu.vector_store %arg8[%c0_31, %c0_32, %c0_33], %57 {strides = array<i32>} : memref<1x4x256xf32, #tpu.memory_space<vmem>>, vector<1x4x256xf32>,
    return
  }
  func.func @transform_0(%arg0: i32) -> (i32, i32, i32) {
    %c0_i32 = arith.constant 0 : i32
    %c0_i32_0 = arith.constant 0 : i32
    %c0_i32_1 = arith.constant 0 : i32
    return %arg0, %c0_i32, %c0_i32_0 : i32, i32, i32
  }
  func.func @transform_1(%arg0: i32) -> (i32, i32) {
    %c0_i32 = arith.constant 0 : i32
    %c0_i32_0 = arith.constant 0 : i32
    %c0_i32_1 = arith.constant 0 : i32
    return %c0_i32, %c0_i32_0 : i32, i32
  }
  func.func @transform_2(%arg0: i32) -> (i32, i32) {
    %c0_i32 = arith.constant 0 : i32
    %c0_i32_0 = arith.constant 0 : i32
    %c0_i32_1 = arith.constant 0 : i32
    return %c0_i32, %c0_i32_0 : i32, i32
  }
  func.func @transform_3(%arg0: i32) -> (i32, i32) {
    %c0_i32 = arith.constant 0 : i32
    %c0_i32_0 = arith.constant 0 : i32
    %c0_i32_1 = arith.constant 0 : i32
    return %c0_i32, %c0_i32_0 : i32, i32
  }
  func.func @transform_4(%arg0: i32) -> (i32, i32) {
    %c0_i32 = arith.constant 0 : i32
    %c0_i32_0 = arith.constant 0 : i32
    %c0_i32_1 = arith.constant 0 : i32
    return %c0_i32, %c0_i32_0 : i32, i32
  }
  func.func @transform_5(%arg0: i32) -> (i32, i32) {
    %c0_i32 = arith.constant 0 : i32
    %c0_i32_0 = arith.constant 0 : i32
    %c0_i32_1 = arith.constant 0 : i32
    return %c0_i32, %c0_i32_0 : i32, i32
  }
  func.func @transform_6(%arg0: i32) -> (i32, i32) {
    %c0_i32 = arith.constant 0 : i32
    %c0_i32_0 = arith.constant 0 : i32
    %c0_i32_1 = arith.constant 0 : i32
    return %c0_i32, %c0_i32_0 : i32, i32
  }
  func.func @transform_7(%arg0: i32) -> (i32, i32, i32) {
    %c0_i32 = arith.constant 0 : i32
    %c0_i32_0 = arith.constant 0 : i32
    %c0_i32_1 = arith.constant 0 : i32
    return %arg0, %c0_i32, %c0_i32_0 : i32, i32, i32
  }
}

</mosaic_0001>

<bundles_post_ra>
// kernel: tpu_custom_call.1
= control target key start
LH: loop header
LB: loop body
LE: loop exit
PB: predicated region body
PF: predicated region fallthrough
CT: control target
= control target key end

     0   :  { %12 = vsyncpa [#allocation3], 0  ;;  %s1330_s0 = inlined_call_operand.vmem [shape: f32[2,4,256], index: 0, kind: input, shape index: {}]   ;;  %s1331_s1 = inlined_call_operand.vmem [shape: f32[256,32], index: 1, kind: input, shape index: {}]   ;;  %s1332_s2 = inlined_call_operand.vmem [shape: f32[32,256], index: 2, kind: input, shape index: {}]   ;;  %s1333_s3 = inlined_call_operand.vmem [shape: f32[8,4], index: 3, kind: input, shape index: {}]   ;;  %s1334_s4 = inlined_call_operand.vmem [shape: f32[8,1], index: 4, kind: input, shape index: {}]   ;;  %s1335_s5 = inlined_call_operand.vmem [shape: f32[8,8], index: 5, kind: input, shape index: {}]   ;;  %s1336_s6 = inlined_call_operand.vmem [shape: f32[8,1], index: 6, kind: input, shape index: {}]   ;;  %s1337_s7 = inlined_call_operand.hbm [shape: f32[2,4,256], index: 7, kind: output, shape index: {}]  }
   0x1   :  { %14 = vsyncpa [#allocation3 + $0x1], 0  ;;  %s1084_s24 = smov 0   ;;  %s1086_s25 = smov 0  }
   0x2   :  { %s1088_s26 = smov 0   ;;  %s1090_s27 = smov 0  }
   0x3 LB: > { %s1105_s28 = sadd.s32 4294967295, %s1038_s27   ;;  %s811_s29 = sadd.s32 4294967294, %s1038_s27   ;;  %s1038_s27 = sphi %s1090_s27, %s1343_s27   ;;  %s1034_s26 = sphi %s1088_s26, %s1342_s26   ;;  %s1030_s25 = sphi %s1086_s25, %s1341_s25   ;;  %s1026_s24 = sphi %s1084_s24, %s1340_s24  }
   0x4   : > { %s1109_s30 = sadd.s32 1, %s1038_s27   ;;  %s179_s8 = sadd.s32 1, %s1034_s26 }
   0x5   : > { %s176_s9 = ssub.s32 %s1038_s27, %s1109_s30  ;;  %p189_p0 = scmp.ne.s32.totalorder %s1034_s26, %s1030_s25 }
   0x6   : > { %p177_p1 = scmp.eq.s32.totalorder %s176_s9, 0  ;;  %p190_p2 = scmp.eq.s32.totalorder %s1105_s28, 1 }
   0x7   : > { %p195_p3 = scmp.ne.s32.totalorder %s1030_s25, %s1026_s24  ;;  %p196_p4 = scmp.eq.s32.totalorder %s811_s29, 1 }
   0x8   : > { %s1120_s10 = scalar_select %p177_p1, %s1034_s26, %s179_s8  }
   0x9   : > { %p1122_p5 = por %p190_p2, %p189_p0  ;;  %p1126_p6 = por %p196_p4, %p195_p3 }
   0xa   : > { %p814_p7 = scmp.ge.s32.totalorder %s1038_s27, 1  ;;  %p240_p8 = scmp.lt.s32.totalorder %s1038_s27, 3 }
   0xc   : > { %p241_p9 = pnand %p814_p7, %p240_p8 }
   0xd   : > { %v294_v0 = vld [vmem:[%s1331_s1 + $0x80] sm:$0xff] (!%p241_p9)  ;;  %v295_v1 = vld [vmem:[%s1331_s1 + $0x88] sm:$0xff] (!%p241_p9)  ;;  %p272_p10 = scmp.lt.s32.totalorder (!%p241_p9), %s1105_s28, 1  ;;  %v296_v5 = vld [vmem:[%s1331_s1 + $0x90] sm:$0xff] (!%p241_p9)  ;;  %v1040_v50 = vmov (!%p241_p9), 0.0   ;;  %vm1041_vm0 = vmmov (!%p241_p9), 0  }
   0xe   : > { %244 = sbr.rel (%p241_p9) target bundleno = 971 (0x3cb), region = 48  ;;  %v278_v2 = vld [vmem:[%s1331_s1] sm:$0xff] (!%p241_p9)  ;;  %v880_v3 = vpack.c.bf16 (!%p241_p9), %v295_v1, %v294_v0  ;;  %v279_v4 = vld [vmem:[%s1331_s1 + $0x8] sm:$0xff] (!%p241_p9)  ;;  %v297_v6 = vld [vmem:[%s1331_s1 + $0x98] sm:$0xff] (!%p241_p9)  ;;  %870 = vmatprep.subr.mxu1 (!%p241_p9), %v1040_v50  ;;  %872 = vmatprep.mubr.msk.f32.mxu1 (!%p241_p9), %vm1041_vm0, %v1040_v50  ;;  %v1042_v52 = vmov (!%p241_p9), 0   ;;  %vm394_vm1 = vcmask (!%p241_p9), 1043456  }
   0xf   : > { %v882_v7 = vpack.c.bf16 (!%p241_p9), %v279_v4, %v278_v2  ;;  %v884_v8 = vpack.c.bf16 (!%p241_p9), %v297_v6, %v296_v5  ;;  %v280_v9 = vld [vmem:[%s1331_s1 + $0x10] sm:$0xff] (!%p241_p9)  ;;  %v281_v10 = vld [vmem:[%s1331_s1 + $0x18] sm:$0xff] (!%p241_p9)  ;;  %v298_v11 = vld [vmem:[%s1331_s1 + $0xa0] sm:$0xff] (!%p241_p9)  ;;  %970 = vset.pattern.permute.xlu0 (!%p241_p9), %v1042_v52  ;;  %vm390_vm2 = vcmask (!%p241_p9), 31744   ;;  %vm480_vm3 = vcmask (!%p241_p9), 64512   ;;  %s269_s23 = sand.u32 (!%p241_p9), 1, %s1030_s25  }
  0x10   : > { %881 = vmatprep.subr.bf16.mxu0 (!%p241_p9), %v880_v3  ;;  %v299_v12 = vld [vmem:[%s1331_s1 + $0xa8] sm:$0xff] (!%p241_p9)  ;;  %v886_v13 = vpack.c.bf16 (!%p241_p9), %v281_v10, %v280_v9  ;;  %v282_v15 = vld [vmem:[%s1331_s1 + $0x20] sm:$0xff] (!%p241_p9)  ;;  %v300_v17 = vld [vmem:[%s1331_s1 + $0xb0] sm:$0xff] (!%p241_p9)  ;;  %vm578_vm5 = vcmask (!%p241_p9), 261120   ;;  %s815_s29 = sshll.u32 (!%p241_p9), %s269_s23, 3  ;;  %s830_s8 = sshll.u32 (!%p241_p9), %s1105_s28, 7 }
  0x11   : > { %883 = vmatpush3.bf16.msra.mxu0 (!%p241_p9), %v882_v7  ;;  %v888_v14 = vpack.c.bf16 (!%p241_p9), %v299_v12, %v298_v11  ;;  %v283_v16 = vld [vmem:[%s1331_s1 + $0x28] sm:$0xff] (!%p241_p9)  ;;  %v301_v18 = vld [vmem:[%s1331_s1 + $0xb8] sm:$0xff] (!%p241_p9)  ;;  %v284_v21 = vld [vmem:[%s1331_s1 + $0x30] sm:$0xff] (!%p241_p9)  ;;  %s271_s9 = scalar_lea.vmem (!%p241_p9), [#allocation2], %s815_s29  ;;  %s1288_s15 = scalar_lea.hbm (!%p241_p9), %s1337_s7, %s830_s8 }
  0x12   : > { %885 = vmatprep.subr.bf16.mxu0 (!%p241_p9), %v884_v8  ;;  %v890_v19 = vpack.c.bf16 (!%p241_p9), %v283_v16, %v282_v15  ;;  %v892_v20 = vpack.c.bf16 (!%p241_p9), %v301_v18, %v300_v17  ;;  %v285_v22 = vld [vmem:[%s1331_s1 + $0x38] sm:$0xff] (!%p241_p9)  ;;  %v302_v23 = vld [vmem:[%s1331_s1 + $0xc0] sm:$0xff] (!%p241_p9)  ;;  %v303_v24 = vld [vmem:[%s1331_s1 + $0xc8] sm:$0xff] (!%p241_p9)  ;;  %s738_s16 = scalar_lea.sflag (!%p241_p9), [#allocation3], %s269_s23 }
  0x13   : > { %v894_v27 = vpack.c.bf16 (!%p241_p9), %v285_v22, %v284_v21  ;;  %v896_v28 = vpack.c.bf16 (!%p241_p9), %v303_v24, %v302_v23  ;;  %v286_v29 = vld [vmem:[%s1331_s1 + $0x40] sm:$0xff] (!%p241_p9)  ;;  %v287_v30 = vld [vmem:[%s1331_s1 + $0x48] sm:$0xff] (!%p241_p9)  ;;  %v304_v31 = vld [vmem:[%s1331_s1 + $0xd0] sm:$0xff] (!%p241_p9)  ;;  %v560_v23 = vlaneseq (!%p241_p9) }
  0x14   : > { %v305_v32 = vld [vmem:[%s1331_s1 + $0xd8] sm:$0xff] (!%p241_p9)  ;;  %v898_v33 = vpack.c.bf16 (!%p241_p9), %v287_v30, %v286_v29  ;;  %v288_v35 = vld [vmem:[%s1331_s1 + $0x50] sm:$0xff] (!%p241_p9)  ;;  %v306_v37 = vld [vmem:[%s1331_s1 + $0xe0] sm:$0xff] (!%p241_p9) }
  0x15   : > { %s273_s17 = scalar_select %p272_p10, %s1105_s28, 1  ;;  %887 = vmatpush3.bf16.msra.mxu0 %v886_v13  ;;  %v900_v34 = vpack.c.bf16 %v305_v32, %v304_v31  ;;  %v289_v36 = vld [vmem:[%s1331_s1 + $0x58] sm:$0xff]  ;;  %v307_v38 = vld [vmem:[%s1331_s1 + $0xe8] sm:$0xff]  ;;  %v290_v41 = vld [vmem:[%s1331_s1 + $0x60] sm:$0xff]  ;;  %v561_v24 = vand.u32 127, %v560_v23 }
  0x16   : > { %889 = vmatprep.subr.bf16.mxu0 %v888_v14  ;;  %v902_v39 = vpack.c.bf16 %v289_v36, %v288_v35  ;;  %v904_v40 = vpack.c.bf16 %v307_v38, %v306_v37  ;;  %v291_v42 = vld [vmem:[%s1331_s1 + $0x68] sm:$0xff]  ;;  %v308_v43 = vld [vmem:[%s1331_s1 + $0xf0] sm:$0xff]  ;;  %v309_v44 = vld [vmem:[%s1331_s1 + $0xf8] sm:$0xff]  ;;  %s1043_s28 = smov [#allocation2]  }
  0x17   : > { %s829_s20 = sshll.u32 %s273_s17, 3  ;;  %v906_v45 = vpack.c.bf16 %v291_v42, %v290_v41  ;;  %v908_v46 = vpack.c.bf16 %v309_v44, %v308_v43  ;;  %v292_v47 = vld [vmem:[%s1331_s1 + $0x70] sm:$0xff]  ;;  %v293_v48 = vld [vmem:[%s1331_s1 + $0x78] sm:$0xff]  ;;  %v384_v51 = vld [vmem:[%s1334_s4] sm:$0xff]  ;;  %vm562_vm4 = vcmp.lt.s32.totalorder %v561_v24, 16  ;;  %vm566_vm6 = vcmp.ge.s32.totalorder %v561_v24, 16 }
  0x18   : > { %s276_s17 = scalar_lea.vmem %s1330_s0, %s829_s20  ;;  %v910_v49 = vpack.c.bf16 %v293_v48, %v292_v47  ;;  %387 = vperm.xlu0 %970, %v384_v51   ;;  %v474_v53 = vld [vmem:[%s1336_s6] sm:$0xff]  ;;  %v571_v4 = vld [vmem:[%s1332_s2 + $0x8] sm:$0xff]  ;;  %v573_v5 = vld [vmem:[%s1332_s2 + $0x18] sm:$0xff]  ;;  %s752_s20 = sshll.u32 %s271_s9, 4  ;;  %s1290_s20 = int_to_ptr.vmem [resolvable:$true] %s752_s20 }
  0x19   : > { %v1191_v25 = vld [vmem:[%s276_s17] sm:$0xff]  ;;  %891 = vmatpush3.bf16.msra.mxu0 %v890_v19  ;;  %v912_v7 = vpack.c.bf16 %v573_v5, %v571_v4  ;;  %v572_v8 = vld [vmem:[%s1332_s2 + $0x10] sm:$0xff]  ;;  %v575_v9 = vld [vmem:[%s1332_s2 + $0x28] sm:$0xff]  ;;  %s976_s18 = scalar_lea.vmem %s1290_s20, 128  ;;  %s980_s17 = sshll.u32 %s1043_s28, 4  ;;  %s981_s17 = int_to_ptr.vmem [resolvable:$false] %s980_s17 }
  0x1a   : > { %v311_v26 = vcombine.high %v1191_v25, %v1191_v25  ;;  %893 = vmatprep.subr.bf16.mxu0 %v892_v20  ;;  %v383_v57 = vld [vmem:[%s1333_s3] sm:$0xff]  ;;  %v577_v10 = vld [vmem:[%s1332_s2 + $0x38] sm:$0xff]  ;;  %v576_v14 = vld [vmem:[%s1332_s2 + $0x30] sm:$0xff]  ;;  %p977_p11 = scmp.ne.s32.totalorder %s1290_s20, %s976_s18  ;;  %s982_s19 = scalar_lea.vmem %s981_s17, 256 }
  0x1b   : > { %v473_v3 = vld [vmem:[%s1335_s5] sm:$0xff]  ;;  %v916_v12 = vpack.c.bf16 %v577_v10, %v575_v9  ;;  %p983_p0 = scmp.lt.s32.totalorder %s1290_s20, %s981_s17  ;;  %p984_p1 = scmp.lt.s32.totalorder %s982_s19, %s976_s18 }
  0x1c   : > { %377 = vmatprep.mubr.f32.mxu0 %v311_v26  ;;  %477 = vperm.xlu0 %970, %v474_v53   ;;  %v570_v6 = vld [vmem:[%s1332_s2] sm:$0xff]  ;;  %p978_p12 = pnand %p977_p11, %p1122_p5 }
  0x1d   : > { %895 = vmatpush3.bf16.msra.mxu0 %v894_v27  ;;  %v914_v11 = vpack.c.bf16 %v572_v8, %v570_v6  ;;  %v574_v13 = vld [vmem:[%s1332_s2 + $0x20] sm:$0xff]  ;;  %p985_p2 = por %p984_p1, %p983_p0 }
  0x1e   : > { %897 = vmatprep.subr.bf16.mxu0 %v896_v28  ;;  %v918_v15 = vpack.c.bf16 %v576_v14, %v574_v13  ;;  %p979_p13 = pneg %p978_p12 }
  0x20   : > { %p986_p3 = pnand %p985_p2, %p979_p13 }
  0x21   : > { %899 = vmatpush3.bf16.msra.mxu0 %v898_v33 }
  0x22   : > { %901 = vmatprep.subr.bf16.mxu0 %v900_v34 }
  0x25   : > { %903 = vmatpush3.bf16.msra.mxu0 %v902_v39 }
  0x26   : > { %905 = vmatprep.subr.bf16.mxu0 %v904_v40 }
  0x29   : > { %907 = vmatpush3.bf16.msra.mxu0 %v906_v45 }
  0x2a   : > { %909 = vmatprep.subr.bf16.mxu0 %v908_v46 }
  0x2d   : > { %911 = vmatpush3.bf16.msra.mxu0 %v910_v49 }
  0x30   : > { %378 = vmatmul.mubr.f32.vlgmr.msra.gmra.mrb[0].mxu0 %v1191_v25 }
  0x97   : > { %v388_v58 = vpop.permute.xlu0 %387 }
  0x9b   : > { %v478_v16 = vpop.permute.xlu0 %477 }
 0x103   : > { %v863_v54 = vpop.f32.mrb[0].mxu0 }
 0x104   : > { %v864_v55 = vpop.f32.mrb[1].mxu0 }
 0x105   : > { %v865_v56 = vadd.f32 %v864_v55, %v863_v54 }
 0x107   : > { %871 = vmatpush3.msk.msra.mxu1 %vm394_vm1, %v865_v56 }
 0x108   : > { %873 = vmatmul.mubr.msk.f32.vlgmr.msra.gmra.mrb[0].mxu1 %vm390_vm2, %v383_v57  ;;  %875 = vmatprep.subr.mxu1 %v1040_v50 }
 0x109   : > { %877 = vmatprep.mubr.msk.f32.mxu1 %vm1041_vm0, %v1040_v50 }
 0x1db   : > { %v464_v59 = vpop.f32.mrb[0].mxu1 }
 0x1dc   : > { %v465_v60 = vadd.f32 %v464_v59, %v388_v58  ;;  %v874_v61 = vpop.f32.mrb[1].mxu1 }
 0x1de   : > { %v468_v62 = vadd.f32 3.0, %v465_v60 }
 0x1e0   : > { %v469_v63 = vmax.f32 %v468_v62, 0.0 }
 0x1e2   : > { %v470_v0 = vmin.f32 %v469_v63, 6.0 }
 0x1e4   : > { %v471_v1 = vmul.f32 %v470_v0, %v465_v60 }
 0x1e6   : > { %v472_v2 = vmul.f32 0.16666667, %v471_v1 }
 0x1e8   : > { %876 = vmatpush3.msra.mxu1 %v472_v2 }
 0x1e9   : > { %878 = vmatmul.mubr.msk.f32.vlgmr.msra.gmra.mrb[2].mxu1 %vm480_vm3, %v473_v3  ;;  %913 = vmatprep.subr.bf16.mxu1 %v912_v7 }
 0x1ea   : > { %646 = vmatprep.mubr.f32.mxu1 %v1040_v50  ;;  %915 = vmatpush1.bf16.msra.mxu1 %v914_v11 }
 0x1eb   : > { %917 = vmatprep.subr.bf16.mxu1 %v916_v12 }
 0x1ee   : > { %919 = vmatpush1.bf16.msra.mxu1 %v918_v15 }
 0x1ef   : > { %921 = vmatprep.subr.bf16.mxu1 %v912_v7 }
 0x2bc   : > { %v550_v17 = vpop.f32.mrb[2].mxu1 }
 0x2bd   : > { %v551_v18 = vadd.f32 %v550_v17, %v478_v16  ;;  %v879_v19 = vpop.f32.mrb[3].mxu1 }
 0x2bf   : > { %v821_v20 = vmul.f32 -1.442695, %v551_v18 }
 0x2c1   : > { %972 = vpow2.f32 %v821_v20 }
 0x2cb   : > { %v973_v21 = vpop.eup %972 }
 0x2cc   : > { %v557_v22 = vadd.f32 1.0, %v973_v21 }
 0x2ce   : > { %974 = vrcp.f32 %v557_v22 }
 0x2d8   : > { %v975_v26 = vpop.eup %974 }
 0x2d9   : > { %v565_v27 = vsel %vm562_vm4, %v975_v26, 0.0  ;;  %v569_v28 = vsel %vm566_vm6, %v975_v26, 0.0 }
 0x2da   : > { %822 = vmatmul.mubr.msk.f32.vlgmr.msra.gmra.mrb[4].mxu1 %vm578_vm5, %v565_v27  ;;  %v654_v29 = vrot.slane %v569_v28, 4 }
 0x2db   : > { %923 = vmatpush1.bf16.msra.mxu1 %v914_v11  ;;  %721 = vmatprep.mubr.f32.mxu1 %v1040_v50 }
 0x2dc   : > { %925 = vmatprep.subr.bf16.mxu1 %v916_v12 }
 0x2df   : > { %927 = vmatpush1.bf16.msra.mxu1 %v918_v15 }
 0x2e2   : > { %823 = vmatmul.mubr.msk.f32.vlgmr.msra.gmra.mrb[6].mxu1 %vm578_vm5, %v654_v29 }
 0x3ad   : > { %v648_v30 = vpop.f32.mrb[4].mxu1 }
 0x3ae   : > { %v650_v31 = vpop.f32.mrb[5].mxu1 }
 0x3b5   : > { %v723_v32 = vpop.f32.mrb[6].mxu1 }
 0x3b6   : > { %v728_v33 = vmul.f32 %v723_v32, %v648_v30  ;;  %v725_v34 = vpop.f32.mrb[7].mxu1 }
 0x3b7   : > { %v729_v35 = vmul.f32 %v725_v34, %v650_v31 }
 0x3b9   : > { %v733_v36 = vcombine.low %v728_v33, %v729_v35 }
 0x3bb   : > { %v735_v37 = vmul.f32 %v733_v36, %v1191_v25 }
 0x3bd   : > { %736 = vst [vmem:[%s271_s9] sm:$0xff] %v735_v37 }
 0x3be   : > { %989 = shalt.err (!%p986_p3)
}
 0x3bf   : > { %s990_s21 = scalar_lea.hbm %s1288_s15, 128  ;;  %s994_s29 = scalar_lea.hbm %s1337_s7, 256 }
 0x3c0   : > { %p991_p4 = scmp.ne.s32.totalorder %s1288_s15, %s990_s21  ;;  %p995_p9 = scmp.lt.u32.totalorder %s1288_s15, %s1337_s7 }
 0x3c1   : > { %p996_p10 = scmp.lt.u32.totalorder %s994_s29, %s990_s21  ;;  %p998_p12 = scmp.lt.u32.totalorder %s990_s21, %s1288_s15 }
 0x3c2   : > { %p992_p7 = pnand %p991_p4, %p1122_p5 }
 0x3c3   : > { %p997_p11 = por %p996_p10, %p995_p9 }
 0x3c4   : > { %p993_p8 = pneg %p992_p7 }
 0x3c5   : > { %p999_p13 = por %p998_p12, %p997_p11 }
 0x3c7   : > { %p1000_p0 = pnand %p999_p13, %p993_p8 }
 0x3c9   : > { %1003 = shalt.err (!%p1000_p0)
}
 0x3ca   : > { %928 = dma.vmem_to_hbm [thread:$0]  (%p1122_p5), %s1290_s20, 128, %s1288_s15, %s738_s16  }
 0x3cb PF: > { %p934_p1 = scmp.ge.s32.totalorder %s1038_s27, 2  ;;  %s764_s13 = sand.u32 1, %s1026_s24  }
 0x3cc   : > { %s765_s14 = scalar_lea.sflag [#allocation3], %s764_s13 }
 0x3cd   : > { %p931_p2 = pnand %p934_p1, %p1126_p6 }
 0x3cf   : > { %1021 = dma.done.wait (!%p931_p2), %s765_s14, 128  }
 0x3d0   : > { %1023 = vsyncadd (!%p931_p2), %s765_s14, 4294967168  ;;  %p17_p3 = scmp.ge.s32.totalorder %s1109_s30, 4   ;;  %s1340_s24 = smov %s1030_s25 }
 0x3d1   : > { %s1341_s25 = smov %s1034_s26  ;;  %s1342_s26 = smov %s1120_s10 }
 0x3d2   : > { %s1343_s27 = smov %s1109_s30  ;;  %19 = sbr.rel (!%p17_p3) target bundleno = 3 (0x3), region = 83 }
 0x3d9   :  { %770 = vsyncpa [#allocation3], 1 }
 0x3da   :  { %772 = vsyncpa [#allocation3 + $0x1], 1 }

</bundles_post_ra>
